<compile_context>
chip_gen: v7x
topology: tpu7x:2x2x1
jax: 0.10.0
libtpu: 0.0.40
codegen_flags: <defaults>
</compile_context>

<pallas_src>
import jax
import jax.numpy as jnp
from jax.experimental import pallas as pl
from jax.experimental.pallas import tpu as pltpu


# ---- tuning knobs -----------------------------------------------------------
_LANE_WIDTHS = (512, 256, 128)       # lane-dense widths (multiples of 128)
_TARGET_TILE_BYTES = 4 << 20         # ~4 MiB per input tile
_VMEM_LIMIT_BYTES = 48 << 20         # safe on v5e/v6e (128 MiB) and v7x (64 MiB/TC)
_MIN_SPLIT_BYTES = 512 << 10         # below this, a single tile is fine
_SMALL_FALLBACK_BYTES = 128 << 10    # below this, fused XLA add wins


def _round_up(a, b):
    return -(-a // b) * b


def _cdiv(a, b):
    return -(-a // b)


def _add_kernel(x_ref, y_ref, out_ref):
    # x2 = x + y  (the only live value; x1 = x + const is dead in the module)
    out_ref[...] = x_ref[...] + y_ref[...]


def broken_net_forward(x, y, const=None, *, use_pallas=None, donate_x=False):
    """Forward of BrokenNet: returns x + y.

    `const` is accepted for signature fidelity with the PyTorch module, but it
    only feeds the dead `x1 = x + const` branch and never reaches the output,
    so it is not computed.

    use_pallas: None = auto (size-based), True/False = force the path.
    donate_x:   alias the output onto x's slab buffer (only if caller can
                donate x; avoids a third full-size HBM allocation).
    """
    del const  # dead branch — intentionally unused
    assert x.shape == y.shape and x.dtype == y.dtype
    orig_shape = x.shape
    n = int(x.size)
    itemsize = x.dtype.itemsize

    if use_pallas is None:
        use_pallas = n * itemsize >= _SMALL_FALLBACK_BYTES
    if n == 0 or not use_pallas:
        return x + y  # tiny inputs: pallas_call launch overhead dominates

    # Pick the widest lane width that divides n -> common case needs no pad
    # copy and no output slice.  Otherwise pad by < 512 elements.
    for w in _LANE_WIDTHS:
        if n % w == 0:
            break
    else:
        w = _LANE_WIDTHS[0]
    rows = _cdiv(n, w)
    n_slab = rows * w

    def to_slab(a):
        flat = a.reshape(-1)
        if n_slab != n:
            flat = jnp.pad(flat, (0, n_slab - n))
        return flat.reshape(rows, w)

    x2d = to_slab(x)
    y2d = to_slab(y)

    slab_bytes = n_slab * itemsize
    if slab_bytes <= _MIN_SPLIT_BYTES:
        # Small slab: one block equal to the full array dims (always legal).
        tile_rows = rows
    else:
        # Split into >= 4 tiles (DMA/compute overlap; both TCs on v7x),
        # capped at ~4 MiB per tile; sublane dim kept a multiple of 8.
        max_tile_rows = max(8, (_TARGET_TILE_BYTES // (w * itemsize)) // 8 * 8)
        tile_rows = min(max_tile_rows, _round_up(_cdiv(rows, 4), 8))
    grid = (_cdiv(rows, tile_rows),)  # ragged last block: Pallas masks it
    # Safe only because the op is purely elementwise (masked-region reads never
    # reach valid output rows) — do NOT reuse this pattern for row reductions.

    out2d = pl.pallas_call(
        _add_kernel,
        out_shape=jax.ShapeDtypeStruct((rows, w), x.dtype),
        grid=grid,
        in_specs=[
            pl.BlockSpec((tile_rows, w), lambda i: (i, 0)),
            pl.BlockSpec((tile_rows, w), lambda i: (i, 0)),
        ],
        out_specs=pl.BlockSpec((tile_rows, w), lambda i: (i, 0)),
        compiler_params=pltpu.CompilerParams(
            # Independent tiles: shard across TensorCores on v7x (2 TCs);
            # harmless no-op on single-TC v5e/v6e.
            dimension_semantics=("parallel",),
            vmem_limit_bytes=_VMEM_LIMIT_BYTES),
        cost_estimate=pl.CostEstimate(
            flops=n_slab, transcendentals=0,
            bytes_accessed=3 * n_slab * itemsize),
        input_output_aliases={0: 0} if donate_x else {},
    )(x2d, y2d)

    out = out2d.reshape(-1)
    if n_slab != n:
        out = out[:n]
    return out.reshape(orig_shape)


if __name__ == "__main__":
    key = jax.random.PRNGKey(0)
    kx, ky = jax.random.split(key)

    # Small NCHW shapes consistent with the module's test harness.
    B, C, H, W = 2, 4, 16, 16
    x = jax.random.normal(kx, (B, C, H, W), dtype=jnp.float32)
    y = jax.random.normal(ky, (B, C, H, W), dtype=jnp.float32)
    const = 5.0  # feeds only the dead "broken" branch

    # Force the Pallas path at this small size (auto dispatch would use the
    # fused-XLA fallback, which is the right production choice here).
    out = jax.block_until_ready(broken_net_forward(x, y, const, use_pallas=True))
    ref = x + y
    assert out.shape == ref.shape and out.dtype == ref.dtype
    assert jnp.allclose(out, ref, atol=1e-6, rtol=1e-6)

    # Ragged element count (not a multiple of 128): exercises the <512-elem
    # pad + output-slice path.
    kx2, ky2 = jax.random.split(ky)
    x2 = jax.random.normal(kx2, (3, 5, 17, 19), dtype=jnp.float32)
    y2 = jax.random.normal(ky2, (3, 5, 17, 19), dtype=jnp.float32)
    out2 = jax.block_until_ready(broken_net_forward(x2, y2, const, use_pallas=True))
    assert jnp.allclose(out2, x2 + y2, atol=1e-6, rtol=1e-6)

    # Medium slab whose row count does not divide the tile: exercises the
    # multi-step grid with a masked ragged last block (no pad, no slice).
    kx3, ky3 = jax.random.split(kx2)
    x3 = jax.random.normal(kx3, (321 * 512,), dtype=jnp.float32)
    y3 = jax.random.normal(ky3, (321 * 512,), dtype=jnp.float32)
    out3 = jax.block_until_ready(broken_net_forward(x3, y3, const, use_pallas=True))
    assert jnp.allclose(out3, x3 + y3, atol=1e-6, rtol=1e-6)

    # Auto-dispatch (fallback) path still matches.
    out4 = jax.block_until_ready(broken_net_forward(x, y, const))
    assert jnp.allclose(out4, ref, atol=1e-6, rtol=1e-6)

    print("KERNEL_OK")
</pallas_src>

<mosaic_0001>
module attributes {stable_mosaic.version = 11 : i64} {
  func.func @_add_kernel(%arg0: i32, %arg1: memref<4x512xf32, #tpu.memory_space<vmem>>, %arg2: memref<4x512xf32, #tpu.memory_space<vmem>>, %arg3: memref<4x512xf32, #tpu.memory_space<vmem>>) attributes {dimension_semantics = [#tpu.dimension_semantics<parallel>], iteration_bounds = array<i64: 1>, scalar_prefetch = 0 : i64, scratch_operands = 0 : i64, tpu.core_type = #tpu.core_type<tc>, window_params = [{transform_indices = @transform_0, window_bounds = array<i64: 4, 512>}, {transform_indices = @transform_1, window_bounds = array<i64: 4, 512>}, {transform_indices = @transform_2, window_bounds = array<i64: 4, 512>}]} {
    %c0 = arith.constant 0 : index
    %c0_0 = arith.constant 0 : index
    %0 = vector.load %arg1[%c0, %c0_0] : memref<4x512xf32, #tpu.memory_space<vmem>>, vector<4x512xf32>
    %c0_1 = arith.constant 0 : index
    %c0_2 = arith.constant 0 : index
    %1 = vector.load %arg2[%c0_1, %c0_2] : memref<4x512xf32, #tpu.memory_space<vmem>>, vector<4x512xf32>
    %2 = arith.addf %0, %1 : vector<4x512xf32>
    %c0_3 = arith.constant 0 : index
    %c0_4 = arith.constant 0 : index
    %3 = vector.load %arg3[%c0_3, %c0_4] : memref<4x512xf32, #tpu.memory_space<vmem>>, vector<4x512xf32>
    tpu.vector_store %arg3[%c0_3, %c0_4], %2 {strides = array<i32>} : memref<4x512xf32, #tpu.memory_space<vmem>>, vector<4x512xf32>,
    return
  }
  func.func @transform_0(%arg0: i32) -> (i32, i32) {
    %c0_i32 = arith.constant 0 : i32
    %c0_i32_0 = arith.constant 0 : i32
    return %arg0, %c0_i32 : i32, i32
  }
  func.func @transform_1(%arg0: i32) -> (i32, i32) {
    %c0_i32 = arith.constant 0 : i32
    %c0_i32_0 = arith.constant 0 : i32
    return %arg0, %c0_i32 : i32, i32
  }
  func.func @transform_2(%arg0: i32) -> (i32, i32) {
    %c0_i32 = arith.constant 0 : i32
    %c0_i32_0 = arith.constant 0 : i32
    return %arg0, %c0_i32 : i32, i32
  }
}

</mosaic_0001>

<bundles_post_ra>
// kernel: tpu_custom_call.1
= control target key start
LH: loop header
LB: loop body
LE: loop exit
PB: predicated region body
PF: predicated region fallthrough
CT: control target
= control target key end

     0   :  { %7 = vsyncpa [#allocation3], 0  ;;  %s189_s0 = inlined_call_operand.hbm [shape: f32[4,512], index: 0, kind: input, shape index: {}]   ;;  %s190_s1 = inlined_call_operand.hbm [shape: f32[4,512], index: 1, kind: input, shape index: {}]   ;;  %s191_s2 = inlined_call_operand.hbm [shape: f32[4,512], index: 2, kind: output, shape index: {}]  }
   0x1   :  { %8 = vsyncpa [#allocation6], 0 }
   0x2   :  { %9 = vsyncpa [#allocation4], 0  ;;  %s135_s9 = smov [#allocation2]   ;;  %s136_s11 = smov [#allocation5]  }
   0x3   :  { %s16_s10 = sshll.u32 %s135_s9, 4  ;;  %s26_s12 = sshll.u32 %s136_s11, 4  ;;  %s17_s10 = int_to_ptr.vmem [resolvable:$true] %s16_s10  ;;  %s27_s12 = int_to_ptr.vmem [resolvable:$true] %s26_s12 }
   0x4   :  { %s63_s15 = scalar_lea.hbm %s189_s0, 256 }
   0x5   :  { %p64_p0 = scmp.ne.s32.totalorder %s189_s0, %s63_s15  ;;  %p67_p1 = scmp.lt.u32.totalorder %s63_s15, %s189_s0 }
   0x7   :  { %p69_p2 = pnand %p67_p1, %p64_p0 }
   0x9   :  { %72 = shalt.err (!%p69_p2)
}
   0xa   :  { %s73_s20 = scalar_lea.vmem %s17_s10, 256  ;;  %p78_p4 = scmp.lt.s32.totalorder %s17_s10, %s17_s10 }
   0xb   :  { %p74_p3 = scmp.ne.s32.totalorder %s17_s10, %s73_s20  ;;  %p79_p5 = scmp.lt.s32.totalorder %s73_s20, %s73_s20 }
   0xd   :  { %p80_p6 = por %p79_p5, %p78_p4 }
   0xf   :  { %p81_p7 = pnand %p80_p6, %p74_p3 }
  0x11   :  { %84 = shalt.err (!%p81_p7)
}
  0x12   :  { %19 = dma.hbm_to_vmem [thread:$0]  %s189_s0, 256, %s17_s10, [#allocation3]  }
  0x13   :  { %s85_s25 = scalar_lea.hbm %s190_s1, 256 }
  0x14   :  { %p86_p8 = scmp.ne.s32.totalorder %s190_s1, %s85_s25  ;;  %p89_p9 = scmp.lt.u32.totalorder %s85_s25, %s190_s1 }
  0x16   :  { %p91_p10 = pnand %p89_p9, %p86_p8 }
  0x18   :  { %94 = shalt.err (!%p91_p10)
}
  0x19   :  { %s95_s30 = scalar_lea.vmem %s27_s12, 256  ;;  %p100_p12 = scmp.lt.s32.totalorder %s27_s12, %s27_s12 }
  0x1a   :  { %p96_p11 = scmp.ne.s32.totalorder %s27_s12, %s95_s30  ;;  %p101_p13 = scmp.lt.s32.totalorder %s95_s30, %s95_s30 }
  0x1c   :  { %p102_p0 = por %p101_p13, %p100_p12 }
  0x1e   :  { %p103_p1 = pnand %p102_p0, %p96_p11 }
  0x20   :  { %106 = shalt.err (!%p103_p1)
}
  0x21   :  { %29 = dma.hbm_to_vmem [thread:$0]  %s190_s1, 256, %s27_s12, [#allocation6]  }
  0x22   :  { %129 = dma.done.wait [#allocation3], 256  }
  0x23   :  { %130 = vsyncadd [#allocation3], 4294967040 }
  0x24   :  { %131 = dma.done.wait [#allocation6], 256  }
  0x25   :  { %132 = vsyncadd [#allocation6], 4294967040  ;;  %s137_s4 = smov [#allocation7]   ;;  %v36_v0 = vld [vmem:[#allocation2] sm:$0xff]  ;;  %v38_v1 = vld [vmem:[#allocation5] sm:$0xff] }
  0x26   :  { %s50_s5 = sshll.u32 %s137_s4, 4  ;;  %v37_v2 = vld [vmem:[#allocation2 + $0x8] sm:$0xff]  ;;  %v40_v3 = vadd.f32 %v38_v1, %v36_v0  ;;  %v39_v4 = vld [vmem:[#allocation5 + $0x8] sm:$0xff]  ;;  %s51_s5 = int_to_ptr.vmem [resolvable:$true] %s50_s5 }
  0x27   :  { %v41_v5 = vadd.f32 %v39_v4, %v37_v2  ;;  %s107_s6 = scalar_lea.vmem %s51_s5, 256  ;;  %p112_p3 = scmp.lt.s32.totalorder %s51_s5, %s51_s5 }
  0x28   :  { %42 = vst [vmem:[#allocation7] sm:$0xff] %v40_v3  ;;  %p108_p2 = scmp.ne.s32.totalorder %s51_s5, %s107_s6  ;;  %p113_p4 = scmp.lt.s32.totalorder %s107_s6, %s107_s6 }
  0x29   :  { %43 = vst [vmem:[#allocation7 + $0x8] sm:$0xff] %v41_v5 }
  0x2a   :  { %p114_p5 = por %p113_p4, %p112_p3 }
  0x2c   :  { %p115_p6 = pnand %p114_p5, %p108_p2 }
  0x2e   :  { %118 = shalt.err (!%p115_p6)
}
  0x2f   :  { %s119_s8 = scalar_lea.hbm %s191_s2, 256 }
  0x30   :  { %p120_p7 = scmp.ne.s32.totalorder %s191_s2, %s119_s8  ;;  %p123_p8 = scmp.lt.u32.totalorder %s119_s8, %s191_s2 }
  0x32   :  { %p125_p9 = pnand %p123_p8, %p120_p7 }
  0x34   :  { %128 = shalt.err (!%p125_p9)
}
  0x35   :  { %53 = dma.vmem_to_hbm [thread:$0]  %s51_s5, 256, %s191_s2, [#allocation4]  }
  0x36   :  { %133 = dma.done.wait [#allocation4], 256  }
  0x37   :  { %134 = vsyncadd [#allocation4], 4294967040 }
  0x38   :  { %57 = vsyncpa [#allocation3], 1 }
  0x39   :  { %58 = vsyncpa [#allocation6], 1 }
  0x3a   :  { %59 = vsyncpa [#allocation4], 1 }

</bundles_post_ra>
